<compile_context>
chip_gen: v7x
topology: tpu7x:2x2x1
jax: 0.10.0
libtpu: 0.0.40
codegen_flags: <defaults>
</compile_context>

<pallas_src>
import jax
import jax.numpy as jnp
from jax.experimental import pallas as pl
from jax.experimental.pallas import tpu as pltpu


def subnet_kernel(x_ref, w1_ref, b1_ref, w2_ref, b2_ref, o_ref):
    # fc1 + ReLU  (MXU matmul, f32 accumulate)
    h = jnp.dot(x_ref[...], w1_ref[...], preferred_element_type=jnp.float32)
    h = jnp.maximum(h + b1_ref[...], 0.0)          # (TM,16) + (1,16) broadcast
    # fc2 + (sigmoid * 3 + 1) epilogue
    y = jnp.dot(h, w2_ref[...], preferred_element_type=jnp.float32)
    y = y + b2_ref[...]                            # (TM,K) + (1,K) broadcast
    o_ref[...] = (jax.nn.sigmoid(y) * 3.0 + 1.0).astype(o_ref.dtype)


def subnet_forward(x, w1, b1, w2, b2, *, block_rows=1024):
    """x: (B, inputdim) f32; w1: (D,16); b1: (1,16); w2: (16,K); b2: (1,K).

    Returns (B, K) f32 = sigmoid(relu(x@w1+b1)@w2+b2)*3 + 1.
    """
    B, D = x.shape
    H = w1.shape[1]            # 16
    K = w2.shape[1]            # numberkernel

    # Batch tile: multiple of 8 sublanes, capped at block_rows; small batches
    # collapse to a single tile.
    tm = min(block_rows, max(8, ((B + 7) // 8) * 8))
    # Pad the batch so every grid step sees a full (tm, D) tile; padded rows
    # are computed but sliced off below (row-wise independent math).
    b_pad = pl.cdiv(B, tm) * tm
    if b_pad != B:
        x = jnp.pad(x, ((0, b_pad - B), (0, 0)))

    out = pl.pallas_call(
        subnet_kernel,
        out_shape=jax.ShapeDtypeStruct((b_pad, K), jnp.float32),
        grid=(b_pad // tm,),
        in_specs=[
            pl.BlockSpec((tm, D), lambda i: (i, 0)),   # x: streamed over batch
            pl.BlockSpec((D, H), lambda i: (0, 0)),    # weights: VMEM-resident
            pl.BlockSpec((1, H), lambda i: (0, 0)),
            pl.BlockSpec((H, K), lambda i: (0, 0)),
            pl.BlockSpec((1, K), lambda i: (0, 0)),
        ],
        out_specs=pl.BlockSpec((tm, K), lambda i: (i, 0)),
        compiler_params=pltpu.CompilerParams(
            dimension_semantics=("parallel",),         # shard batch tiles across TCs
        ),
    )(x, w1, b1, w2, b2)

    return out[:B] if b_pad != B else out


def reference_forward(x, w1, b1, w2, b2):
    h = jnp.maximum(x @ w1 + b1, 0.0)
    y = h @ w2 + b2
    return jax.nn.sigmoid(y) * 3.0 + 1.0


if __name__ == "__main__":
    # Shapes consistent with the module: inputdim=32, hidden=16, numberkernel=4.
    # Small batch=64 with block_rows=32 -> 2 grid steps (exercises the
    # pipelined multi-tile path while staying tiny).
    batch, inputdim, hidden, numberkernel = 64, 32, 16, 4

    key = jax.random.PRNGKey(0)
    kx, k1, kb1, k2, kb2 = jax.random.split(key, 5)

    x  = jax.random.normal(kx, (batch, inputdim), dtype=jnp.float32)
    # Deterministic parameter init (uniform, scaled like PyTorch's Linear default).
    w1 = jax.random.uniform(k1,  (inputdim, hidden), dtype=jnp.float32,
                            minval=-1.0, maxval=1.0) / jnp.sqrt(inputdim)
    b1 = jax.random.uniform(kb1, (1, hidden), dtype=jnp.float32,
                            minval=-1.0, maxval=1.0) / jnp.sqrt(inputdim)
    w2 = jax.random.uniform(k2,  (hidden, numberkernel), dtype=jnp.float32,
                            minval=-1.0, maxval=1.0) / jnp.sqrt(hidden)
    b2 = jax.random.uniform(kb2, (1, numberkernel), dtype=jnp.float32,
                            minval=-1.0, maxval=1.0) / jnp.sqrt(hidden)

    out = subnet_forward(x, w1, b1, w2, b2, block_rows=32)
    jax.block_until_ready(out)
    ref = reference_forward(x, w1, b1.reshape(-1), w2, b2.reshape(-1))
    assert out.shape == (batch, numberkernel)
    assert jnp.allclose(out, ref, atol=1e-5, rtol=1e-5), "mismatch vs reference (batched)"

    # Also exercise the small / non-multiple-of-8 batch path (padding + slice).
    x_small = x[:13]
    out_small = subnet_forward(x_small, w1, b1, w2, b2)
    jax.block_until_ready(out_small)
    ref_small = reference_forward(x_small, w1, b1.reshape(-1), w2, b2.reshape(-1))
    assert out_small.shape == (13, numberkernel)
    assert jnp.allclose(out_small, ref_small, atol=1e-5, rtol=1e-5), "mismatch vs reference (small)"

    print("KERNEL_OK")
</pallas_src>

<mosaic_0001>
module attributes {stable_mosaic.version = 11 : i64} {
  func.func @subnet_kernel(%arg0: i32, %arg1: memref<32x32xf32, #tpu.memory_space<vmem>>, %arg2: memref<32x16xf32, #tpu.memory_space<vmem>>, %arg3: memref<1x16xf32, #tpu.memory_space<vmem>>, %arg4: memref<16x4xf32, #tpu.memory_space<vmem>>, %arg5: memref<1x4xf32, #tpu.memory_space<vmem>>, %arg6: memref<32x4xf32, #tpu.memory_space<vmem>>) attributes {dimension_semantics = [#tpu.dimension_semantics<parallel>], iteration_bounds = array<i64: 2>, scalar_prefetch = 0 : i64, scratch_operands = 0 : i64, tpu.core_type = #tpu.core_type<tc>, window_params = [{transform_indices = @transform_0, window_bounds = array<i64: 32, 32>}, {pipeline_mode = #tpu.pipeline_mode<synchronous>, transform_indices = @transform_1, window_bounds = array<i64: 32, 16>}, {pipeline_mode = #tpu.pipeline_mode<synchronous>, transform_indices = @transform_2, window_bounds = array<i64: 1, 16>}, {pipeline_mode = #tpu.pipeline_mode<synchronous>, transform_indices = @transform_3, window_bounds = array<i64: 16, 4>}, {pipeline_mode = #tpu.pipeline_mode<synchronous>, transform_indices = @transform_4, window_bounds = array<i64: 1, 4>}, {transform_indices = @transform_5, window_bounds = array<i64: 32, 4>}]} {
    %c0 = arith.constant 0 : index
    %c0_0 = arith.constant 0 : index
    %0 = vector.load %arg1[%c0, %c0_0] : memref<32x32xf32, #tpu.memory_space<vmem>>, vector<32x32xf32>
    %c0_1 = arith.constant 0 : index
    %c0_2 = arith.constant 0 : index
    %1 = vector.load %arg2[%c0_1, %c0_2] : memref<32x16xf32, #tpu.memory_space<vmem>>, vector<32x16xf32>
    %cst = arith.constant dense<0.000000e+00> : vector<32x16xf32>
    %2 = tpu.matmul %0, %1, %cst {dimension_numbers = #tpu.dot_dimension_numbers<[1], [0], [0], [1], [0, 0, 1, 1], [], []>} : vector<32x32xf32>, vector<32x16xf32>, vector<32x16xf32> -> vector<32x16xf32>
    %c0_3 = arith.constant 0 : index
    %c0_4 = arith.constant 0 : index
    %3 = vector.load %arg3[%c0_3, %c0_4] : memref<1x16xf32, #tpu.memory_space<vmem>>, vector<1x16xf32>
    %4 = vector.broadcast %3 : vector<1x16xf32> to vector<32x16xf32>
    %5 = arith.addf %2, %4 : vector<32x16xf32>
    %cst_5 = arith.constant 0.000000e+00 : f32
    %6 = vector.broadcast %cst_5 : f32 to vector<32x16xf32>
    %7 = arith.maximumf %5, %6 : vector<32x16xf32>
    %c0_6 = arith.constant 0 : index
    %c0_7 = arith.constant 0 : index
    %8 = vector.load %arg4[%c0_6, %c0_7] : memref<16x4xf32, #tpu.memory_space<vmem>>, vector<16x4xf32>
    %cst_8 = arith.constant dense<0.000000e+00> : vector<32x4xf32>
    %9 = tpu.matmul %7, %8, %cst_8 {dimension_numbers = #tpu.dot_dimension_numbers<[1], [0], [0], [1], [0, 0, 1, 1], [], []>} : vector<32x16xf32>, vector<16x4xf32>, vector<32x4xf32> -> vector<32x4xf32>
    %c0_9 = arith.constant 0 : index
    %c0_10 = arith.constant 0 : index
    %10 = vector.load %arg5[%c0_9, %c0_10] : memref<1x4xf32, #tpu.memory_space<vmem>>, vector<1x4xf32>
    %11 = vector.broadcast %10 : vector<1x4xf32> to vector<32x4xf32>
    %12 = arith.addf %9, %11 : vector<32x4xf32>
    %13 = arith.negf %12 : vector<32x4xf32>
    %14 = math.exp %13 : vector<32x4xf32>
    %cst_11 = arith.constant 1.000000e+00 : f32
    %15 = vector.broadcast %cst_11 : f32 to vector<32x4xf32>
    %16 = arith.addf %15, %14 : vector<32x4xf32>
    %17 = arith.divf %15, %16 : vector<32x4xf32>
    %cst_12 = arith.constant 3.000000e+00 : f32
    %18 = vector.broadcast %cst_12 : f32 to vector<32x4xf32>
    %19 = arith.mulf %17, %18 : vector<32x4xf32>
    %cst_13 = arith.constant 1.000000e+00 : f32
    %20 = vector.broadcast %cst_13 : f32 to vector<32x4xf32>
    %21 = arith.addf %19, %20 : vector<32x4xf32>
    %c0_14 = arith.constant 0 : index
    %c0_15 = arith.constant 0 : index
    %22 = vector.load %arg6[%c0_14, %c0_15] : memref<32x4xf32, #tpu.memory_space<vmem>>, vector<32x4xf32>
    tpu.vector_store %arg6[%c0_14, %c0_15], %21 {strides = array<i32>} : memref<32x4xf32, #tpu.memory_space<vmem>>, vector<32x4xf32>,
    return
  }
  func.func @transform_0(%arg0: i32) -> (i32, i32) {
    %c0_i32 = arith.constant 0 : i32
    %c0_i32_0 = arith.constant 0 : i32
    return %arg0, %c0_i32 : i32, i32
  }
  func.func @transform_1(%arg0: i32) -> (i32, i32) {
    %c0_i32 = arith.constant 0 : i32
    %c0_i32_0 = arith.constant 0 : i32
    %c0_i32_1 = arith.constant 0 : i32
    return %c0_i32, %c0_i32_0 : i32, i32
  }
  func.func @transform_2(%arg0: i32) -> (i32, i32) {
    %c0_i32 = arith.constant 0 : i32
    %c0_i32_0 = arith.constant 0 : i32
    %c0_i32_1 = arith.constant 0 : i32
    return %c0_i32, %c0_i32_0 : i32, i32
  }
  func.func @transform_3(%arg0: i32) -> (i32, i32) {
    %c0_i32 = arith.constant 0 : i32
    %c0_i32_0 = arith.constant 0 : i32
    %c0_i32_1 = arith.constant 0 : i32
    return %c0_i32, %c0_i32_0 : i32, i32
  }
  func.func @transform_4(%arg0: i32) -> (i32, i32) {
    %c0_i32 = arith.constant 0 : i32
    %c0_i32_0 = arith.constant 0 : i32
    %c0_i32_1 = arith.constant 0 : i32
    return %c0_i32, %c0_i32_0 : i32, i32
  }
  func.func @transform_5(%arg0: i32) -> (i32, i32) {
    %c0_i32 = arith.constant 0 : i32
    %c0_i32_0 = arith.constant 0 : i32
    return %arg0, %c0_i32 : i32, i32
  }
}

</mosaic_0001>

<bundles_post_ra>
// kernel: tpu_custom_call.1
= control target key start
LH: loop header
LB: loop body
LE: loop exit
PB: predicated region body
PF: predicated region fallthrough
CT: control target
= control target key end

     0   :  { %s682_s18 = smov 0   ;;  %s730_s0 = inlined_call_operand.vmem [shape: f32[64,32], index: 0, kind: input, shape index: {}]   ;;  %s731_s1 = inlined_call_operand.vmem [shape: f32[32,16], index: 1, kind: input, shape index: {}]   ;;  %s732_s2 = inlined_call_operand.vmem [shape: f32[1,16], index: 2, kind: input, shape index: {}]   ;;  %s733_s3 = inlined_call_operand.vmem [shape: f32[16,4], index: 3, kind: input, shape index: {}]   ;;  %s734_s4 = inlined_call_operand.vmem [shape: f32[1,4], index: 4, kind: input, shape index: {}]   ;;  %s735_s5 = inlined_call_operand.vmem [shape: f32[64,4], index: 5, kind: output, shape index: {}]  }
   0x1 LB: > { %s545_s19 = sadd.s32 4294967295, %s650_s18   ;;  %p549_p0 = scmp.ge.s32.totalorder %s650_s18, 1  ;;  %s650_s18 = sphi %s682_s18, %s15_s18  }
   0x2   : > { %p188_p1 = scmp.lt.s32.totalorder %s650_s18, 3 }
   0x4   : > { %p189_p2 = pnand %p549_p0, %p188_p1 }
   0x5   : > { %v232_v0 = vld [vmem:[%s731_s1] sm:$0xff] (!%p189_p2)  ;;  %v233_v1 = vld [vmem:[%s731_s1 + $0x8] sm:$0xff] (!%p189_p2)  ;;  %v234_v2 = vld [vmem:[%s731_s1 + $0x10] sm:$0xff] (!%p189_p2)  ;;  %s550_s26 = sshll.u32 (!%p189_p2), %s545_s19, 2  ;;  %vm243_vm0 = vcmask (!%p189_p2), 261120   ;;  %vm354_vm1 = vcmask (!%p189_p2), 130048  }
   0x6   : > { %192 = sbr.rel (%p189_p2) target bundleno = 486 (0x1e6), region = 40  ;;  %v608_v3 = vpack.c.bf16 (!%p189_p2), %v233_v1, %v232_v0  ;;  %v235_v4 = vld [vmem:[%s731_s1 + $0x18] sm:$0xff] (!%p189_p2)  ;;  %p217_p3 = scmp.lt.s32.totalorder (!%p189_p2), %s550_s26, 7  ;;  %v345_v10 = vld [vmem:[%s733_s3] sm:$0xff] (!%p189_p2)  ;;  %v346_v11 = vld [vmem:[%s733_s3 + $0x8] sm:$0xff] (!%p189_p2)  ;;  %vm484_vm2 = vcmask (!%p189_p2), 31744  }
   0x7   : > { %v612_v5 = vpack.c.bf16 (!%p189_p2), %v235_v4, %v234_v2  ;;  %v616_v12 = vpack.c.bf16 (!%p189_p2), %v346_v11, %v345_v10  ;;  %v554_v13 = vld [vmem:[%s732_s2] ss:$0 sm:$0xff] (!%p189_p2) }
   0x8   : > { %609 = vmatprep.subr.bf16.mxu0 (!%p189_p2), %v608_v3  ;;  %v559_v26 = vld [vmem:[%s734_s4] ss:$0 sm:$0xff] (!%p189_p2) }
   0x9   : > { %611 = vmatpush3.bf16.msra.mxu0 (!%p189_p2), %v608_v3  ;;  %617 = vmatprep.subr.bf16.mxu1 (!%p189_p2), %v616_v12 }
   0xa   : > { %613 = vmatprep.subr.bf16.mxu0 (!%p189_p2), %v612_v5  ;;  %619 = vmatpush3.bf16.msra.mxu1 (!%p189_p2), %v616_v12 }
   0xd   : > { %s737_s26 = smov (!%p217_p3, %s550_s26), 7  ;;  %615 = vmatpush3.bf16.msra.mxu0 %v612_v5 }
   0xe   : > { %s551_s29 = sshll.u32 %s737_s26, 3 }
   0xf   : > { %s220_s7 = scalar_lea.vmem %s730_s0, %s551_s29  ;;  %s226_s19 = scalar_lea.vmem %s735_s5, %s551_s29 }
  0x10   : > { %v228_v6 = vld [vmem:[%s220_s7] sm:$0xff]  ;;  %v229_v7 = vld [vmem:[%s220_s7 + $0x8] sm:$0xff]  ;;  %v230_v8 = vld [vmem:[%s220_s7 + $0x10] sm:$0xff] }
  0x11   : > { %592 = vmatprep.mubr.msk.f32.mxu0 %vm243_vm0, %v228_v6  ;;  %v231_v9 = vld [vmem:[%s220_s7 + $0x18] sm:$0xff] }
  0x12   : > { %593 = vmatmul.mubr.msk.f32.vlgmr.msra.gmra.mrb[0].mxu0 %vm243_vm0, %v229_v7 }
  0x13   : > { %595 = vmatprep.mubr.msk.f32.mxu0 %vm243_vm0, %v230_v8 }
  0x16   : > { %596 = vmatmul.mubr.msk.f32.gmra.mrb[2].mxu0 %vm243_vm0, %v231_v9 }
  0xe5   : > { %v594_v14 = vpop.f32.mrb[0].mxu0 }
  0xe6   : > { %v328_v15 = vadd.f32 %v594_v14, %v554_v13  ;;  %v322_v16 = vpop.f32.mrb[1].mxu0 }
  0xe7   : > { %v323_v17 = vadd.f32 %v554_v13, %v322_v16 }
  0xe8   : > { %v342_v20 = vmax.f32 %v328_v15, 0.0 }
  0xe9   : > { %v341_v18 = vmax.f32 %v323_v17, 0.0  ;;  %v597_v19 = vpop.f32.mrb[2].mxu0 }
  0xea   : > { %v338_v21 = vadd.f32 %v597_v19, %v554_v13  ;;  %v332_v22 = vpop.f32.mrb[3].mxu0 }
  0xeb   : > { %v333_v23 = vadd.f32 %v554_v13, %v332_v22  ;;  %602 = vmatprep.mubr.msk.f32.mxu1 %vm354_vm1, %v341_v18 }
  0xec   : > { %603 = vmatmul.mubr.msk.f32.vlgmr.msra.gmra.mrb[0].mxu1 %vm354_vm1, %v342_v20  ;;  %v344_v25 = vmax.f32 %v338_v21, 0.0 }
  0xed   : > { %v343_v24 = vmax.f32 %v333_v23, 0.0 }
  0xef   : > { %605 = vmatprep.mubr.msk.f32.mxu1 %vm354_vm1, %v343_v24 }
  0xf0   : > { %606 = vmatmul.mubr.msk.f32.gmra.mrb[2].mxu1 %vm354_vm1, %v344_v25 }
 0x1bf   : > { %v604_v27 = vpop.f32.mrb[0].mxu1 }
 0x1c0   : > { %v439_v28 = vadd.f32 %v604_v27, %v559_v26  ;;  %v433_v29 = vpop.f32.mrb[1].mxu1 }
 0x1c1   : > { %v434_v30 = vadd.f32 %v559_v26, %v433_v29 }
 0x1c2   : > { %v565_v31 = vmul.f32 -1.442695, %v439_v28 }
 0x1c3   : > { %v564_v32 = vmul.f32 -1.442695, %v434_v30  ;;  %v607_v33 = vpop.f32.mrb[2].mxu1 }
 0x1c4   : > { %628 = vpow2.f32 %v565_v31  ;;  %v449_v34 = vadd.f32 %v607_v33, %v559_v26  ;;  %v443_v35 = vpop.f32.mrb[3].mxu1 }
 0x1c5   : > { %630 = vpow2.f32 %v564_v32  ;;  %v444_v36 = vadd.f32 %v559_v26, %v443_v35 }
 0x1c6   : > { %v567_v37 = vmul.f32 -1.442695, %v449_v34 }
 0x1c7   : > { %v566_v38 = vmul.f32 -1.442695, %v444_v36 }
 0x1c8   : > { %632 = vpow2.f32 %v567_v37 }
 0x1c9   : > { %634 = vpow2.f32 %v566_v38 }
 0x1ce   : > { %v629_v39 = vpop.eup %628 }
 0x1cf   : > { %v631_v40 = vpop.eup %630  ;;  %v465_v41 = vadd.f32 1.0, %v629_v39 }
 0x1d0   : > { %v464_v42 = vadd.f32 1.0, %v631_v40 }
 0x1d1   : > { %636 = vrcp.f32 %v465_v41 }
 0x1d2   : > { %v633_v43 = vpop.eup %632  ;;  %638 = vrcp.f32 %v464_v42 }
 0x1d3   : > { %v635_v44 = vpop.eup %634  ;;  %v467_v45 = vadd.f32 1.0, %v633_v43 }
 0x1d4   : > { %v466_v46 = vadd.f32 1.0, %v635_v44 }
 0x1d5   : > { %640 = vrcp.f32 %v467_v45 }
 0x1d6   : > { %642 = vrcp.f32 %v466_v46 }
 0x1db   : > { %v637_v47 = vpop.eup %636 }
 0x1dc   : > { %v639_v48 = vpop.eup %638  ;;  %v477_v49 = vmul.f32 3.0, %v637_v47 }
 0x1dd   : > { %v476_v50 = vmul.f32 3.0, %v639_v48 }
 0x1de   : > { %v481_v54 = vadd.f32 1.0, %v477_v49 }
 0x1df   : > { %v641_v51 = vpop.eup %640  ;;  %v480_v52 = vadd.f32 1.0, %v476_v50 }
 0x1e0   : > { %v643_v53 = vpop.eup %642  ;;  %v479_v55 = vmul.f32 3.0, %v641_v51  ;;  %486 = vst.msk [vmem:[%s226_s19 + $0x8] sm:$0xff] %vm484_vm2, %v481_v54 }
 0x1e1   : > { %485 = vst.msk [vmem:[%s226_s19] sm:$0xff] %vm484_vm2, %v480_v52  ;;  %v478_v56 = vmul.f32 3.0, %v643_v53 }
 0x1e2   : > { %v483_v58 = vadd.f32 1.0, %v479_v55 }
 0x1e3   : > { %v482_v57 = vadd.f32 1.0, %v478_v56 }
 0x1e4   : > { %488 = vst.msk [vmem:[%s226_s19 + $0x18] sm:$0xff] %vm484_vm2, %v483_v58 }
 0x1e5   : > { %487 = vst.msk [vmem:[%s226_s19 + $0x10] sm:$0xff] %vm484_vm2, %v482_v57 }
 0x1e6 PF: > { %s15_s18 = sadd.s32 1, %s650_s18  }
 0x1e7   : > { %p12_p4 = scmp.ge.s32.totalorder %s15_s18, 4  }
 0x1e9   :  { %14 = sbr.rel (!%p12_p4) target bundleno = 1 (0x1), region = 70 }

</bundles_post_ra>
